<compile_context>
chip_gen: v7x
topology: tpu7x:2x2x1
jax: 0.10.0
libtpu: 0.0.40
codegen_flags: <defaults>
</compile_context>

<pallas_src>
import functools

import numpy as np
import jax
import jax.numpy as jnp
from jax.experimental import pallas as pl
from jax.experimental.pallas import tpu as pltpu


def _round_up(x: int, m: int) -> int:
    return ((x + m - 1) // m) * m


def _linear_kernel_multi_k(x_ref, w_ref, b_ref, o_ref, acc_ref):
    # x_ref:   (tm, tk)  block of x (compute dtype)       in VMEM
    # w_ref:   (tk, tn)  block of W^T, already (IN, OUT)  in VMEM
    # b_ref:   (1,  tn)  block of bias (f32)              in VMEM
    # o_ref:   (tm, tn)  output block                     in VMEM
    # acc_ref: (tm, tn)  f32 accumulator scratch          in VMEM
    k = pl.program_id(2)

    @pl.when(k == 0)
    def _():
        acc_ref[...] = jnp.zeros_like(acc_ref)

    acc_ref[...] += jnp.dot(x_ref[...], w_ref[...],
                            preferred_element_type=jnp.float32)

    @pl.when(k == pl.num_programs(2) - 1)
    def _():
        o_ref[...] = (acc_ref[...] + b_ref[...]).astype(o_ref.dtype)


def _linear_kernel_single_k(x_ref, w_ref, b_ref, o_ref):
    # Whole K reduction fits in one tile: no accumulator RMW needed.
    o_ref[...] = (jnp.dot(x_ref[...], w_ref[...],
                          preferred_element_type=jnp.float32)
                  + b_ref[...]).astype(o_ref.dtype)


@functools.partial(
    jax.jit,
    static_argnames=("out_features", "tm_max", "tn", "tk", "compute_dtype"))
def _forward_impl(x, w_prepared, b_prepared, *, out_features, tm_max, tn, tk,
                  compute_dtype):
    out_dtype = x.dtype
    B, in_features = x.shape
    Kp, Np = w_prepared.shape
    assert in_features <= Kp

    sub = 8 if compute_dtype.itemsize >= 4 else 16
    tm = min(tm_max, _round_up(B, sub))
    Mp = _round_up(B, tm)

    # Only x is padded per call; weight/bias padding was hoisted to init time.
    xc = x.astype(compute_dtype)
    if Mp != B or Kp != in_features:
        xc = jnp.pad(xc, ((0, Mp - B), (0, Kp - in_features)))

    gm, gn, gk = Mp // tm, Np // tn, Kp // tk

    c_item = compute_dtype.itemsize
    o_item = out_dtype.itemsize
    cost = pl.CostEstimate(
        flops=2 * Mp * Kp * Np,
        # Account for HBM revisits: x streamed gn times, W streamed gm times.
        bytes_accessed=(Mp * Kp * gn * c_item + Kp * Np * gm * c_item
                        + Mp * Np * o_item + Np * 4 * gm * gn),
        transcendentals=0,
    )

    # Double-buffered inputs/outputs + f32 accumulator; keep well below the
    # 64 MiB/TC physical VMEM on v7x while raising the small scoped default.
    footprint = (2 * (tm * tk + tk * tn) * c_item
                 + 2 * tm * tn * o_item + 2 * tn * 4 + tm * tn * 4)
    vmem_limit = int(min(max(footprint * 3 // 2 + (4 << 20), 32 << 20),
                         64 << 20))

    if gk == 1:
        grid = (gm, gn)
        in_specs = [
            pl.BlockSpec((tm, tk), lambda i, j: (i, 0)),   # x
            pl.BlockSpec((tk, tn), lambda i, j: (0, j)),   # W^T (IN, OUT)
            pl.BlockSpec((1, tn), lambda i, j: (0, j)),    # bias
        ]
        out_specs = pl.BlockSpec((tm, tn), lambda i, j: (i, j))
        scratch_shapes = []
        kernel = _linear_kernel_single_k
        dim_sem = ("parallel", "parallel")
    else:
        grid = (gm, gn, gk)
        in_specs = [
            pl.BlockSpec((tm, tk), lambda i, j, k: (i, k)),   # x
            pl.BlockSpec((tk, tn), lambda i, j, k: (k, j)),   # W^T (IN, OUT)
            pl.BlockSpec((1, tn), lambda i, j, k: (0, j)),    # bias
        ]
        out_specs = pl.BlockSpec((tm, tn), lambda i, j, k: (i, j))
        scratch_shapes = [pltpu.VMEM((tm, tn), jnp.float32)]
        kernel = _linear_kernel_multi_k
        dim_sem = ("parallel", "parallel", "arbitrary")

    out_p = pl.pallas_call(
        kernel,
        out_shape=jax.ShapeDtypeStruct((Mp, Np), out_dtype),
        grid_spec=pltpu.PrefetchScalarGridSpec(
            num_scalar_prefetch=0,
            grid=grid,
            in_specs=in_specs,
            out_specs=out_specs,
            scratch_shapes=scratch_shapes,
        ),
        compiler_params=pltpu.CompilerParams(
            dimension_semantics=dim_sem,
            vmem_limit_bytes=vmem_limit,
        ),
        cost_estimate=cost,
    )(xc, w_prepared, b_prepared)

    if Mp == B and Np == out_features:
        return out_p
    return out_p[:B, :out_features]


class IntermediatePallas:
    """Pallas-TPU equivalent of `Intermediate` (a single nn.Linear).

    Parameter layout transform (transpose to (IN, OUT)), padding to tile
    multiples and the optional bf16 cast all happen once here — never in the
    per-call forward path.
    """

    def __init__(self, weight, bias, *, tm=512, tn=512, tk=1024,
                 compute_dtype=jnp.float32, batch_hint=None):
        weight = jnp.asarray(weight)
        bias = jnp.asarray(bias)
        out_features, in_features = weight.shape
        assert bias.shape == (out_features,)
        self.in_features = int(in_features)
        self.out_features = int(out_features)
        self.compute_dtype = np.dtype(compute_dtype)
        sub = 8 if self.compute_dtype.itemsize >= 4 else 16

        # Lane dims are multiples of 128 (defaults are multiples of 256 for
        # the v6e/v7x 2x256x256 MXU geometry), clamped to the aligned problem.
        self.tk = min(tk, _round_up(self.in_features, 128))
        np_align = _round_up(self.out_features, 128)
        self.tn = min(tn, np_align)

        # v7x: if the whole batch fits in a single M-tile, split the N grid so
        # both TensorCores (sharded over "parallel" dims) get work.
        if (batch_hint is not None
                and _round_up(int(batch_hint), sub) <= tm
                and np_align >= 256 and self.tn >= np_align):
            self.tn = _round_up((np_align + 1) // 2, 128)

        self.tm_max = tm
        self.Kp = _round_up(self.in_features, self.tk)
        self.Np = _round_up(self.out_features, self.tn)

        # One-time prep: transpose to (IN, OUT) -> no in-kernel XLU transpose,
        # zero-pad to tile multiples, cast weight to the compute dtype.
        w_t = weight.T  # (IN, OUT)
        w_t = jnp.pad(w_t, ((0, self.Kp - self.in_features),
                            (0, self.Np - self.out_features)))
        self.w_prepared = w_t.astype(self.compute_dtype)
        b = bias.reshape(1, self.out_features).astype(jnp.float32)
        self.b_prepared = jnp.pad(b, ((0, 0), (0, self.Np - self.out_features)))

    def __call__(self, x):
        return _forward_impl(
            x, self.w_prepared, self.b_prepared,
            out_features=self.out_features,
            tm_max=self.tm_max, tn=self.tn, tk=self.tk,
            compute_dtype=self.compute_dtype)


if __name__ == "__main__":
    # Small shapes consistent with the Linear forward.
    B, IN_FEATURES, OUT_FEATURES = 8, 32, 16

    key = jax.random.PRNGKey(0)
    kx, kw, kb = jax.random.split(key, 3)

    x = jax.random.normal(kx, (B, IN_FEATURES), dtype=jnp.float32)
    # PyTorch Linear default init: U(-1/sqrt(in), 1/sqrt(in)).
    bound = 1.0 / (IN_FEATURES ** 0.5)
    weight = jax.random.uniform(kw, (OUT_FEATURES, IN_FEATURES),
                                jnp.float32, -bound, bound)
    bias = jax.random.uniform(kb, (OUT_FEATURES,), jnp.float32, -bound, bound)

    ref = jnp.dot(x, weight.T, precision=jax.lax.Precision.HIGHEST) + bias

    # 1) f32 path (K fits in a single tile -> scratch-free kernel).
    mod = IntermediatePallas(weight, bias, batch_hint=B)
    out = jax.block_until_ready(mod(x))
    assert out.shape == (B, OUT_FEATURES)
    assert jnp.allclose(out, ref, atol=1e-5, rtol=1e-5), "f32 single-K mismatch"

    # 2) f32 multi-K accumulator path (force small tiles over a longer K).
    B2, IN2, OUT2 = 8, 512, 256
    kx2, kw2, kb2 = jax.random.split(jax.random.PRNGKey(1), 3)
    x2 = jax.random.normal(kx2, (B2, IN2), dtype=jnp.float32)
    w2 = jax.random.normal(kw2, (OUT2, IN2), dtype=jnp.float32) * (1.0 / IN2 ** 0.5)
    b2 = jax.random.normal(kb2, (OUT2,), dtype=jnp.float32)
    ref2 = jnp.dot(x2, w2.T, precision=jax.lax.Precision.HIGHEST) + b2
    mod2 = IntermediatePallas(w2, b2, tm=128, tn=128, tk=128, batch_hint=B2)
    out2 = jax.block_until_ready(mod2(x2))
    assert out2.shape == (B2, OUT2)
    assert jnp.allclose(out2, ref2, atol=1e-4, rtol=1e-4), "f32 multi-K mismatch"

    # 3) bf16 operand path (f32 accumulation) — numerics change, looser check.
    mod_bf16 = IntermediatePallas(weight, bias, compute_dtype=jnp.bfloat16,
                                  batch_hint=B)
    out_bf16 = jax.block_until_ready(mod_bf16(x))
    assert out_bf16.shape == (B, OUT_FEATURES)
    assert jnp.allclose(out_bf16, ref, atol=3e-2, rtol=3e-2), "bf16 mismatch"

    print("KERNEL_OK")
</pallas_src>

<mosaic_0001>
module attributes {stable_mosaic.version = 11 : i64} {
  func.func @_linear_kernel_single_k(%arg0: i32, %arg1: i32, %arg2: memref<8x128xf32, #tpu.memory_space<vmem>>, %arg3: memref<128x128xf32, #tpu.memory_space<vmem>>, %arg4: memref<1x128xf32, #tpu.memory_space<vmem>>, %arg5: memref<8x128xf32, #tpu.memory_space<vmem>>) attributes {dimension_semantics = [#tpu.dimension_semantics<parallel>, #tpu.dimension_semantics<parallel>], iteration_bounds = array<i64: 1, 1>, scalar_prefetch = 0 : i64, scratch_operands = 0 : i64, tpu.core_type = #tpu.core_type<tc>, window_params = [{transform_indices = @transform_0, window_bounds = array<i64: 8, 128>}, {transform_indices = @transform_1, window_bounds = array<i64: 128, 128>}, {transform_indices = @transform_2, window_bounds = array<i64: 1, 128>}, {transform_indices = @transform_3, window_bounds = array<i64: 8, 128>}]} {
    %c0 = arith.constant 0 : index
    %c0_0 = arith.constant 0 : index
    %0 = vector.load %arg2[%c0, %c0_0] : memref<8x128xf32, #tpu.memory_space<vmem>>, vector<8x128xf32>
    %c0_1 = arith.constant 0 : index
    %c0_2 = arith.constant 0 : index
    %1 = vector.load %arg3[%c0_1, %c0_2] : memref<128x128xf32, #tpu.memory_space<vmem>>, vector<128x128xf32>
    %cst = arith.constant dense<0.000000e+00> : vector<8x128xf32>
    %2 = tpu.matmul %0, %1, %cst {dimension_numbers = #tpu.dot_dimension_numbers<[1], [0], [0], [1], [0, 0, 1, 1], [], []>} : vector<8x128xf32>, vector<128x128xf32>, vector<8x128xf32> -> vector<8x128xf32>
    %c0_3 = arith.constant 0 : index
    %c0_4 = arith.constant 0 : index
    %3 = vector.load %arg4[%c0_3, %c0_4] : memref<1x128xf32, #tpu.memory_space<vmem>>, vector<1x128xf32>
    %4 = vector.broadcast %3 : vector<1x128xf32> to vector<8x128xf32>
    %5 = arith.addf %2, %4 : vector<8x128xf32>
    %c0_5 = arith.constant 0 : index
    %c0_6 = arith.constant 0 : index
    %6 = vector.load %arg5[%c0_5, %c0_6] : memref<8x128xf32, #tpu.memory_space<vmem>>, vector<8x128xf32>
    tpu.vector_store %arg5[%c0_5, %c0_6], %5 {strides = array<i32>} : memref<8x128xf32, #tpu.memory_space<vmem>>, vector<8x128xf32>,
    return
  }
  func.func @transform_0(%arg0: i32, %arg1: i32) -> (i32, i32) {
    %c0_i32 = arith.constant 0 : i32
    %c0_i32_0 = arith.constant 0 : i32
    return %arg0, %c0_i32 : i32, i32
  }
  func.func @transform_1(%arg0: i32, %arg1: i32) -> (i32, i32) {
    %c0_i32 = arith.constant 0 : i32
    %c0_i32_0 = arith.constant 0 : i32
    return %c0_i32, %arg1 : i32, i32
  }
  func.func @transform_2(%arg0: i32, %arg1: i32) -> (i32, i32) {
    %c0_i32 = arith.constant 0 : i32
    %c0_i32_0 = arith.constant 0 : i32
    return %c0_i32, %arg1 : i32, i32
  }
  func.func @transform_3(%arg0: i32, %arg1: i32) -> (i32, i32) {
    %c0_i32 = arith.constant 0 : i32
    return %arg0, %arg1 : i32, i32
  }
}

</mosaic_0001>

<bundles_post_ra>
// kernel: _forward_impl.1
= control target key start
LH: loop header
LB: loop body
LE: loop exit
PB: predicated region body
PF: predicated region fallthrough
CT: control target
= control target key end

     0   :  { %8 = vsyncpa [#allocation3], 0  ;;  %s328_s0 = inlined_call_operand.vmem [shape: f32[8,128], index: 0, kind: input, shape index: {}]   ;;  %s329_s1 = inlined_call_operand.hbm [shape: f32[128,128], index: 1, kind: input, shape index: {}]   ;;  %s330_s2 = inlined_call_operand.vmem [shape: f32[1,128], index: 2, kind: input, shape index: {}]   ;;  %s331_s3 = inlined_call_operand.hbm [shape: f32[8,128], index: 3, kind: output, shape index: {}]  }
   0x1   :  { %9 = vsyncpa [#allocation4], 0  ;;  %s271_s12 = smov [#allocation2]   ;;  %s223_s16 = scalar_lea.hbm %s329_s1, 2048 }
   0x2   :  { %s17_s13 = sshll.u32 %s271_s12, 4  ;;  %p224_p0 = scmp.ne.s32.totalorder %s329_s1, %s223_s16  ;;  %s18_s13 = int_to_ptr.vmem [resolvable:$true] %s17_s13 }
   0x3   :  { %p227_p1 = scmp.lt.u32.totalorder %s223_s16, %s329_s1 }
   0x5   :  { %p229_p2 = pnand %p227_p1, %p224_p0 }
   0x7   :  { %232 = shalt.err (!%p229_p2)
}
   0x8   :  { %s233_s21 = scalar_lea.vmem %s18_s13, 2048  ;;  %p238_p4 = scmp.lt.s32.totalorder %s18_s13, %s18_s13 }
   0x9   :  { %p234_p3 = scmp.ne.s32.totalorder %s18_s13, %s233_s21  ;;  %p239_p5 = scmp.lt.s32.totalorder %s233_s21, %s233_s21 }
   0xb   :  { %p240_p6 = por %p239_p5, %p238_p4 }
   0xd   :  { %p241_p7 = pnand %p240_p6, %p234_p3 }
   0xf   :  { %244 = shalt.err (!%p241_p7)
}
  0x10   :  { %s272_s22 = smov 128   ;;  %s273_s23 = smov 8  }
  0x11   :  { %23 = dma.hbm_to_vmem [thread:$0]  %s329_s1, 2048, %s18_s13, [#allocation3], %s272_s22, %s272_s22, %s273_s23  }
  0x12   :  { %267 = dma.done.wait [#allocation3], 2048  }
  0x13   :  { %268 = vsyncadd [#allocation3], 4294965248  ;;  %v274_v0 = vmov 0.0|0.0   ;;  %vm275_vm0 = vmmov 0   ;;  %v276_v1 = vmov 0.0   ;;  %v30_v2 = vld [vmem:[#allocation2] sm:$0xff] }
  0x14   :  { %192 = vmatprep.subr.bf16.mxu0 %v274_v0  ;;  %189 = vmatprep.mubr.msk.f32.mxu0 %vm275_vm0, %v276_v1  ;;  %v31_v3 = vld [vmem:[#allocation2 + $0x8] sm:$0xff]  ;;  %v32_v4 = vld [vmem:[#allocation2 + $0x10] sm:$0xff]  ;;  %v33_v6 = vld [vmem:[#allocation2 + $0x18] sm:$0xff]  ;;  %s277_s29 = smov [#allocation5]  }
  0x15   :  { %v193_v5 = vpack.c.bf16 %v31_v3, %v30_v2  ;;  %v196_v7 = vpack.c.bf16 %v33_v6, %v32_v4  ;;  %v34_v8 = vld [vmem:[#allocation2 + $0x20] sm:$0xff]  ;;  %v35_v9 = vld [vmem:[#allocation2 + $0x28] sm:$0xff]  ;;  %v36_v11 = vld [vmem:[#allocation2 + $0x30] sm:$0xff]  ;;  %s130_s30 = sshll.u32 %s277_s29, 4  ;;  %s131_s30 = int_to_ptr.vmem [resolvable:$true] %s130_s30 }
  0x16   :  { %v199_v10 = vpack.c.bf16 %v35_v9, %v34_v8  ;;  %v37_v12 = vld [vmem:[#allocation2 + $0x38] sm:$0xff]  ;;  %v38_v14 = vld [vmem:[#allocation2 + $0x40] sm:$0xff]  ;;  %v39_v15 = vld [vmem:[#allocation2 + $0x48] sm:$0xff]  ;;  %s245_s4 = scalar_lea.vmem %s131_s30, 128  ;;  %p250_p9 = scmp.lt.s32.totalorder %s131_s30, %s131_s30 }
  0x17   :  { %194 = vmatpush3.bf16.msra.mxu0 %v193_v5  ;;  %v202_v13 = vpack.c.bf16 %v37_v12, %v36_v11  ;;  %v205_v16 = vpack.c.bf16 %v39_v15, %v38_v14  ;;  %v40_v17 = vld [vmem:[#allocation2 + $0x50] sm:$0xff]  ;;  %v41_v18 = vld [vmem:[#allocation2 + $0x58] sm:$0xff]  ;;  %v42_v20 = vld [vmem:[#allocation2 + $0x60] sm:$0xff]  ;;  %p246_p8 = scmp.ne.s32.totalorder %s131_s30, %s245_s4  ;;  %p251_p10 = scmp.lt.s32.totalorder %s245_s4, %s245_s4 }
  0x18   :  { %195 = vmatprep.subr.bf16.mxu0 %v274_v0  ;;  %v208_v19 = vpack.c.bf16 %v41_v18, %v40_v17  ;;  %v43_v21 = vld [vmem:[#allocation2 + $0x68] sm:$0xff]  ;;  %v44_v23 = vld [vmem:[#allocation2 + $0x70] sm:$0xff]  ;;  %v45_v24 = vld [vmem:[#allocation2 + $0x78] sm:$0xff] }
  0x19   :  { %v211_v22 = vpack.c.bf16 %v43_v21, %v42_v20  ;;  %v214_v25 = vpack.c.bf16 %v45_v24, %v44_v23  ;;  %v29_v26 = vld [vmem:[%s328_s0] sm:$0xff]  ;;  %p252_p11 = por %p251_p10, %p250_p9 }
  0x1a   :  { %v139_v27 = vld [vmem:[%s330_s2] ss:$0 sm:$0xff] }
  0x1b   :  { %197 = vmatpush3.bf16.msra.mxu0 %v196_v7  ;;  %p253_p12 = pnand %p252_p11, %p246_p8 }
  0x1c   :  { %198 = vmatprep.subr.bf16.mxu0 %v274_v0 }
  0x1f   :  { %200 = vmatpush3.bf16.msra.mxu0 %v199_v10 }
  0x20   :  { %201 = vmatprep.subr.bf16.mxu0 %v274_v0 }
  0x23   :  { %203 = vmatpush3.bf16.msra.mxu0 %v202_v13 }
  0x24   :  { %204 = vmatprep.subr.bf16.mxu0 %v274_v0 }
  0x27   :  { %206 = vmatpush3.bf16.msra.mxu0 %v205_v16 }
  0x28   :  { %207 = vmatprep.subr.bf16.mxu0 %v274_v0 }
  0x2b   :  { %209 = vmatpush3.bf16.msra.mxu0 %v208_v19 }
  0x2c   :  { %210 = vmatprep.subr.bf16.mxu0 %v274_v0 }
  0x2f   :  { %212 = vmatpush3.bf16.msra.mxu0 %v211_v22 }
  0x30   :  { %213 = vmatprep.subr.bf16.mxu0 %v274_v0 }
  0x33   :  { %215 = vmatpush3.bf16.msra.mxu0 %v214_v25 }
  0x36   :  { %190 = vmatmul.mubr.f32.vlgmr.msra.gmra.mrb[0].mxu0 %v29_v26 }
 0x109   :  { %v119_v28 = vpop.f32.mrb[0].mxu0 }
 0x10a   :  { %v120_v29 = vadd.f32 %v139_v27, %v119_v28  ;;  %v191_v30 = vpop.f32.mrb[1].mxu0 }
 0x10c   :  { %123 = vst [vmem:[#allocation5] sm:$0xff] %v120_v29 }
 0x10d   :  { %256 = shalt.err (!%p253_p12)
}
 0x10e   :  { %s257_s6 = scalar_lea.hbm %s331_s3, 128 }
 0x10f   :  { %p258_p13 = scmp.ne.s32.totalorder %s331_s3, %s257_s6  ;;  %p261_p0 = scmp.lt.u32.totalorder %s257_s6, %s331_s3 }
 0x111   :  { %p263_p1 = pnand %p261_p0, %p258_p13 }
 0x113   :  { %266 = shalt.err (!%p263_p1)
}
 0x114   :  { %133 = dma.vmem_to_hbm [thread:$0]  %s131_s30, 128, %s331_s3, [#allocation4]  }
 0x115   :  { %269 = dma.done.wait [#allocation4], 128  }
 0x116   :  { %270 = vsyncadd [#allocation4], 4294967168 }
 0x117   :  { %137 = vsyncpa [#allocation3], 1 }
 0x118   :  { %138 = vsyncpa [#allocation4], 1 }

</bundles_post_ra>
